<compile_context>
chip_gen: v7x
topology: tpu7x:2x2x1
jax: 0.10.0
libtpu: 0.0.40
codegen_flags: <defaults>
</compile_context>

<pallas_src>
import functools

import jax
import jax.numpy as jnp
from jax.experimental import pallas as pl
from jax.experimental.pallas import tpu as pltpu

_MiB = 1024 * 1024


def _spec_normalize_kernel(x_ref, o_ref, *, eps):
    # x_ref: (TB, H*W) — each row is one flattened (batch, channel) spectrogram.
    x = x_ref[...]
    # Reduce in the native dtype (no full-tile f32 temporary); only the (TB, 1)
    # row statistics are promoted to f32.
    mn = jnp.min(x, axis=-1, keepdims=True).astype(jnp.float32)
    mx = jnp.max(x, axis=-1, keepdims=True).astype(jnp.float32)
    inv = pl.reciprocal(mx - mn + eps, approx=False)     # (TB, 1), EUP slot
    # Upcast of x is folded into the fused elementwise normalize.
    o_ref[...] = ((x.astype(jnp.float32) - mn) * inv).astype(o_ref.dtype)


def _plan_tiling(nc: int, hw: int, itemsize: int):
    """Pick (tb rows per step, buffer_count, vmem_limit_bytes)."""
    # Packed-sublane multiple: f32 -> 8, bf16 -> 16, int8/fp8 -> 32.
    sub = max(8, 32 // max(itemsize, 1))
    row_bytes = hw * itemsize

    # Generation-aware VMEM budget (v5e/v6e: 128 MiB, v7x: 64 MiB per core).
    try:
        vmem_cap = int(pltpu.get_tpu_info().vmem_capacity_bytes)
    except Exception:
        vmem_cap = 64 * _MiB  # conservative fallback
    # Total pipelined footprint = (input tile + output tile) * buffer_count.
    footprint_budget = max(vmem_cap // 8, 2 * _MiB)

    min_tb = nc if nc < sub else sub
    buffers = 2  # double-buffer input and output by default
    if 2 * buffers * min_tb * row_bytes > footprint_budget:
        # Huge-row guard: even the smallest legal tile overflows the budget
        # when double-buffered; fall back to single-buffered DMA.
        buffers = 1
        # TODO(synk): for H*W so large that even a single (min_tb, H*W)
        # in+out pair exceeds physical VMEM, chunk the H*W axis in-kernel
        # (min/max carry pass + normalize pass via memory_space=pl.ANY +
        # pltpu.emit_pipeline) instead of one full-row tile.

    per_tile_budget = footprint_budget // (2 * buffers)
    tb = max(sub, (per_tile_budget // max(row_bytes, 1)) // sub * sub)

    # Keep >= 4 grid steps (>= 2 for small nc) when possible: megacore
    # sharding on v7x plus normal DMA/compute overlap everywhere.
    min_steps = 4
    if nc >= min_steps * sub:
        tb = min(tb, max(sub, (nc // min_steps) // sub * sub))
    elif nc >= 2 * sub:
        tb = min(tb, max(sub, (nc // 2) // sub * sub))
    else:
        tb = nc  # tiny input: one full-extent block (always legal)
    tb = min(tb, nc)

    footprint = 2 * buffers * tb * row_bytes
    vmem_limit = int(min(vmem_cap * 3 // 4, max(footprint + 2 * _MiB, 16 * _MiB)))
    return tb, buffers, vmem_limit


def spec_normalize(x: jax.Array, eps: float = 1e-8,
                   donate_input: bool = False) -> jax.Array:
    """Pallas implementation of SpecNormalize.forward for NCHW input."""
    n, c, h, w = x.shape
    nc = n * c
    hw = h * w
    x_flat = x.reshape(nc, hw)

    itemsize = jnp.dtype(x.dtype).itemsize
    tb, buffers, vmem_limit = _plan_tiling(nc, hw, itemsize)
    grid = (pl.cdiv(nc, tb),)

    idx_map = lambda i: (i, 0)
    if buffers == 1:
        in_spec = pl.BlockSpec((tb, hw), idx_map, pipeline_mode=pl.Buffered(1))
        out_spec = pl.BlockSpec((tb, hw), idx_map, pipeline_mode=pl.Buffered(1))
    else:
        in_spec = pl.BlockSpec((tb, hw), idx_map)
        out_spec = pl.BlockSpec((tb, hw), idx_map)

    kernel = functools.partial(_spec_normalize_kernel, eps=eps)

    total = x.size
    cost = pl.CostEstimate(
        flops=3 * total,          # sub + mul + (min/max compares, approx.)
        transcendentals=0,
        bytes_accessed=2 * x.nbytes,
    )

    out_flat = pl.pallas_call(
        kernel,
        out_shape=jax.ShapeDtypeStruct((nc, hw), x.dtype),
        grid_spec=pltpu.PrefetchScalarGridSpec(
            num_scalar_prefetch=0,
            grid=grid,
            in_specs=[in_spec],
            out_specs=out_spec,
        ),
        compiler_params=pltpu.CompilerParams(
            dimension_semantics=("parallel",),
            vmem_limit_bytes=vmem_limit,
        ),
        cost_estimate=cost,
        input_output_aliases=({0: 0} if donate_input else {}),
    )(x_flat)

    return out_flat.reshape(n, c, h, w)


def _reference(x: jax.Array, eps: float = 1e-8) -> jax.Array:
    # Pure-JAX reference mirroring the PyTorch module.
    mn = jnp.min(jnp.min(x, axis=-1, keepdims=True), axis=-2, keepdims=True)
    mx = jnp.max(jnp.max(x, axis=-1, keepdims=True), axis=-2, keepdims=True)
    return (x - mn) / (mx - mn + eps)


if __name__ == "__main__":
    key = jax.random.PRNGKey(0)
    k1, k2, k3 = jax.random.split(key, 3)

    # Primary: NCHW spectrogram batch, f32.
    x1 = jax.random.normal(k1, (2, 4, 16, 16), dtype=jnp.float32)
    o1 = jax.block_until_ready(spec_normalize(x1, eps=1e-8))
    assert o1.shape == x1.shape and o1.dtype == x1.dtype
    assert jnp.allclose(o1, _reference(x1), atol=1e-5, rtol=1e-5)

    # Ragged grid (nc=20 not a multiple of tb) + lane-unaligned H*W (192).
    x2 = jax.random.normal(k2, (4, 5, 16, 12), dtype=jnp.float32)
    o2 = jax.block_until_ready(spec_normalize(x2, eps=1e-8))
    assert jnp.allclose(o2, _reference(x2), atol=1e-5, rtol=1e-5)

    # bfloat16 path: native-dtype min/max, f32 row stats, sublane multiple 16.
    x3 = jax.random.normal(k3, (2, 4, 16, 16), dtype=jnp.bfloat16)
    o3 = jax.block_until_ready(spec_normalize(x3, eps=1e-8))
    ref3 = _reference(x3.astype(jnp.float32))
    assert o3.dtype == jnp.bfloat16
    assert jnp.allclose(o3.astype(jnp.float32), ref3, atol=2e-2, rtol=2e-2)

    print("KERNEL_OK")
</pallas_src>

<mosaic_0001>
module attributes {stable_mosaic.version = 11 : i64} {
  func.func @_spec_normalize_kernel(%arg0: i32, %arg1: memref<8x256xf32, #tpu.memory_space<vmem>>, %arg2: memref<8x256xf32, #tpu.memory_space<vmem>>) attributes {dimension_semantics = [#tpu.dimension_semantics<parallel>], iteration_bounds = array<i64: 1>, scalar_prefetch = 0 : i64, scratch_operands = 0 : i64, tpu.core_type = #tpu.core_type<tc>, window_params = [{transform_indices = @transform_0, window_bounds = array<i64: 8, 256>}, {transform_indices = @transform_1, window_bounds = array<i64: 8, 256>}]} {
    %c0 = arith.constant 0 : index
    %c0_0 = arith.constant 0 : index
    %0 = vector.load %arg1[%c0, %c0_0] : memref<8x256xf32, #tpu.memory_space<vmem>>, vector<8x256xf32>
    %cst = arith.constant dense<0x7F800000> : vector<8xf32>
    %1 = vector.multi_reduction <minimumf>, %0, %cst [1] : vector<8x256xf32> to vector<8xf32>
    %2 = vector.shape_cast %1 : vector<8xf32> to vector<8x1xf32>
    %cst_1 = arith.constant dense<0xFF800000> : vector<8xf32>
    %3 = vector.multi_reduction <maximumf>, %0, %cst_1 [1] : vector<8x256xf32> to vector<8xf32>
    %4 = vector.shape_cast %3 : vector<8xf32> to vector<8x1xf32>
    %5 = arith.subf %4, %2 : vector<8x1xf32>
    %cst_2 = arith.constant 9.99999993E-9 : f32
    %6 = vector.broadcast %cst_2 : f32 to vector<8x1xf32>
    %7 = arith.addf %5, %6 : vector<8x1xf32>
    %8 = tpu.reciprocal %7 : vector<8x1xf32> -> vector<8x1xf32>
    %9 = vector.broadcast %2 : vector<8x1xf32> to vector<8x256xf32>
    %10 = arith.subf %0, %9 : vector<8x256xf32>
    %11 = vector.broadcast %8 : vector<8x1xf32> to vector<8x256xf32>
    %12 = arith.mulf %10, %11 : vector<8x256xf32>
    %c0_3 = arith.constant 0 : index
    %c0_4 = arith.constant 0 : index
    %13 = vector.load %arg2[%c0_3, %c0_4] : memref<8x256xf32, #tpu.memory_space<vmem>>, vector<8x256xf32>
    tpu.vector_store %arg2[%c0_3, %c0_4], %12 {strides = array<i32>} : memref<8x256xf32, #tpu.memory_space<vmem>>, vector<8x256xf32>,
    return
  }
  func.func @transform_0(%arg0: i32) -> (i32, i32) {
    %c0_i32 = arith.constant 0 : i32
    %c0_i32_0 = arith.constant 0 : i32
    return %arg0, %c0_i32 : i32, i32
  }
  func.func @transform_1(%arg0: i32) -> (i32, i32) {
    %c0_i32 = arith.constant 0 : i32
    %c0_i32_0 = arith.constant 0 : i32
    return %arg0, %c0_i32 : i32, i32
  }
}

</mosaic_0001>

<bundles_post_ra>
// kernel: tpu_custom_call.1
= control target key start
LH: loop header
LB: loop body
LE: loop exit
PB: predicated region body
PF: predicated region fallthrough
CT: control target
= control target key end

     0   :  { %6 = vsyncpa [#allocation3], 0  ;;  %s141_s0 = inlined_call_operand.hbm [shape: f32[8,256], index: 0, kind: input, shape index: {}]   ;;  %s142_s1 = inlined_call_operand.hbm [shape: f32[8,256], index: 1, kind: output, shape index: {}]  }
   0x1   :  { %7 = vsyncpa [#allocation4], 0  ;;  %s105_s6 = smov [#allocation2]   ;;  %s57_s10 = scalar_lea.hbm %s141_s0, 256 }
   0x2   :  { %s14_s7 = sshll.u32 %s105_s6, 4  ;;  %p58_p0 = scmp.ne.s32.totalorder %s141_s0, %s57_s10  ;;  %s15_s7 = int_to_ptr.vmem [resolvable:$true] %s14_s7 }
   0x3   :  { %p61_p1 = scmp.lt.u32.totalorder %s57_s10, %s141_s0 }
   0x5   :  { %p63_p2 = pnand %p61_p1, %p58_p0 }
   0x7   :  { %66 = shalt.err (!%p63_p2)
}
   0x8   :  { %s67_s15 = scalar_lea.vmem %s15_s7, 256  ;;  %p72_p4 = scmp.lt.s32.totalorder %s15_s7, %s15_s7 }
   0x9   :  { %p68_p3 = scmp.ne.s32.totalorder %s15_s7, %s67_s15  ;;  %p73_p5 = scmp.lt.s32.totalorder %s67_s15, %s67_s15 }
   0xb   :  { %p74_p6 = por %p73_p5, %p72_p4 }
   0xd   :  { %p75_p7 = pnand %p74_p6, %p68_p3 }
   0xf   :  { %78 = shalt.err (!%p75_p7)
}
  0x10   :  { %17 = dma.hbm_to_vmem [thread:$0]  %s141_s0, 256, %s15_s7, [#allocation3]  }
  0x11   :  { %101 = dma.done.wait [#allocation3], 256  }
  0x12   :  { %102 = vsyncadd [#allocation3], 4294967040  ;;  %v21_v0 = vld [vmem:[#allocation2] sm:$0xff]  ;;  %v22_v1 = vld [vmem:[#allocation2 + $0x8] sm:$0xff]  ;;  %s106_s18 = smov [#allocation5]  }
  0x13   :  { %v23_v2 = vmin.f32 %v21_v0, %v22_v1  ;;  %v26_v3 = vmax.f32 %v21_v0, %v22_v1  ;;  %s44_s19 = sshll.u32 %s106_s18, 4  ;;  %s45_s19 = int_to_ptr.vmem [resolvable:$true] %s44_s19 }
  0x14   :  { %s79_s0 = scalar_lea.vmem %s45_s19, 256  ;;  %p84_p9 = scmp.lt.s32.totalorder %s45_s19, %s45_s19 }
  0x15   :  { %24 = vmin.xlane.f32.xlu0 %v23_v2  ;;  %p80_p8 = scmp.ne.s32.totalorder %s45_s19, %s79_s0  ;;  %p85_p10 = scmp.lt.s32.totalorder %s79_s0, %s79_s0 }
  0x17   :  { %p86_p11 = por %p85_p10, %p84_p9 }
  0x19   :  { %27 = vmax.xlane.f32.xlu0 %v26_v3  ;;  %p87_p12 = pnand %p86_p11, %p80_p8 }
  0xa2   :  { %v25_v4 = vpop.xlane.xlu0 %24 }
  0xa3   :  { %v32_v8 = vsub.f32 %v21_v0, %v25_v4  ;;  %v33_v9 = vsub.f32 %v22_v1, %v25_v4 }
  0xa6   :  { %v28_v5 = vpop.xlane.xlu0 %27 }
  0xa7   :  { %v29_v6 = vsub.f32 %v28_v5, %v25_v4 }
  0xa9   :  { %v30_v7 = vadd.f32 1e-08, %v29_v6 }
  0xab   :  { %55 = vrcp.f32 %v30_v7 }
  0xb5   :  { %v56_v10 = vpop.eup %55 }
  0xb6   :  { %v34_v11 = vmul.f32 %v56_v10, %v32_v8  ;;  %v35_v12 = vmul.f32 %v56_v10, %v33_v9 }
  0xb8   :  { %36 = vst [vmem:[#allocation5] sm:$0xff] %v34_v11  ;;  %37 = vst [vmem:[#allocation5 + $0x8] sm:$0xff] %v35_v12 }
  0xb9   :  { %90 = shalt.err (!%p87_p12)
}
  0xba   :  { %s91_s22 = scalar_lea.hbm %s142_s1, 256 }
  0xbb   :  { %p92_p13 = scmp.ne.s32.totalorder %s142_s1, %s91_s22  ;;  %p95_p0 = scmp.lt.u32.totalorder %s91_s22, %s142_s1 }
  0xbd   :  { %p97_p1 = pnand %p95_p0, %p92_p13 }
  0xbf   :  { %100 = shalt.err (!%p97_p1)
}
  0xc0   :  { %47 = dma.vmem_to_hbm [thread:$0]  %s45_s19, 256, %s142_s1, [#allocation4]  }
  0xc1   :  { %103 = dma.done.wait [#allocation4], 256  }
  0xc2   :  { %104 = vsyncadd [#allocation4], 4294967040 }
  0xc3   :  { %51 = vsyncpa [#allocation3], 1 }
  0xc4   :  { %52 = vsyncpa [#allocation4], 1 }

</bundles_post_ra>
